<compile_context>
chip_gen: v7x
topology: tpu7x:2x2x1
jax: 0.10.0
libtpu: 0.0.40
codegen_flags: <defaults>
</compile_context>

<pallas_src>
import functools
import math

import jax
import jax.numpy as jnp
from jax import lax
from jax.experimental import pallas as pl
from jax.experimental.pallas import tpu as pltpu


_LN_EPS = 1e-6  # towhee ViT uses nn.LayerNorm(..., eps=1e-6) in blocks and head.


# ----------------------------------------------------------------------------
# shared math helpers
# ----------------------------------------------------------------------------
def _round_up(x, m):
    return ((x + m - 1) // m) * m


def _layer_norm_f32(x, gamma, beta, eps=_LN_EPS):
    x = x.astype(jnp.float32)
    mu = jnp.mean(x, axis=-1, keepdims=True)
    var = jnp.mean(jnp.square(x - mu), axis=-1, keepdims=True)
    return (x - mu) * lax.rsqrt(var + eps) * gamma + beta


# Abramowitz & Stegun 7.1.26 erf polynomial (abs err ~1.5e-7); kernel flavour
# pushes the reciprocal onto the EUP slot.
_ERF_A = (0.254829592, -0.284496736, 1.421413741, -1.453152027, 1.061405429)
_ERF_P = 0.3275911


def _gelu_kernel(x):
    a1, a2, a3, a4, a5 = _ERF_A
    z = x * (1.0 / math.sqrt(2.0))
    az = jnp.abs(z)
    t = pl.reciprocal(1.0 + _ERF_P * az, approx=True)
    poly = ((((a5 * t + a4) * t + a3) * t + a2) * t + a1) * t
    erf = 1.0 - poly * jnp.exp(-az * az)
    erf = jnp.where(z >= 0, erf, -erf)
    return 0.5 * x * (1.0 + erf)


# ----------------------------------------------------------------------------
# Pallas kernels
# ----------------------------------------------------------------------------
def _embed_kernel(patches_ref, wp_ref, bp_ref, cls_ref, pos_ref, out_ref, *, seq_valid):
    # patches: (1, Sp, P) f32   wp: (P, D) bf16   bp/cls: (1, D) f32
    # pos: (seq_valid, D) f32   out: (1, S_pad, D) f32
    S_pad, D = out_ref.shape[1], out_ref.shape[2]
    patches = patches_ref[0].astype(jnp.bfloat16)                      # (Sp, P)
    emb = jnp.dot(patches, wp_ref[...],
                  preferred_element_type=jnp.float32) + bp_ref[...]    # (Sp, D) f32
    # Direct slice stores (no jnp.concatenate); padded tail rows are zeroed.
    out_ref[0] = jnp.zeros((S_pad, D), jnp.float32)
    out_ref[0, 0:1, :] = cls_ref[...] + pos_ref[0:1, :]
    out_ref[0, 1:seq_valid, :] = emb + pos_ref[1:seq_valid, :]


def _attn_kernel(x_ref, ln_g_ref, ln_b_ref, wqkv_ref, bqkv_ref, wo_ref, bo_ref,
                 out_ref, attn_scr, *, num_heads, seq_valid):
    # x: (1, S_pad, D) f32; wqkv: (D, 3D) bf16; wo: (D, D) bf16; biases f32.
    x = x_ref[0]                                                       # (S_pad, D) f32
    S_pad, D = x.shape
    hd = D // num_heads
    scale = 1.0 / math.sqrt(hd)

    xn = _layer_norm_f32(x, ln_g_ref[...], ln_b_ref[...]).astype(jnp.bfloat16)
    qkv = jnp.dot(xn, wqkv_ref[...],
                  preferred_element_type=jnp.float32) + bqkv_ref[...]  # (S_pad, 3D)
    q = qkv[:, 0:D]
    k = qkv[:, D:2 * D]
    v = qkv[:, 2 * D:3 * D]

    key_ok = None
    if seq_valid < S_pad:  # mask padded key positions (static condition)
        key_ok = lax.broadcasted_iota(jnp.int32, (S_pad, S_pad), 1) < seq_valid

    # TODO(synk): heads are processed one-at-a-time (static unroll); batching
    # >=2 heads per MXU call would raise utilization further for small head_dim.
    for h in range(num_heads):
        sl = slice(h * hd, (h + 1) * hd)
        qh = q[:, sl].astype(jnp.bfloat16)
        kh = k[:, sl].astype(jnp.bfloat16)
        vh = v[:, sl].astype(jnp.bfloat16)
        # Contract last dims directly -> no kh.T relayout.
        s = lax.dot_general(qh, kh, (((1,), (1,)), ((), ())),
                            preferred_element_type=jnp.float32) * scale
        if key_ok is not None:
            s = jnp.where(key_ok, s, -1e30)
        s = s - jnp.max(s, axis=-1, keepdims=True)
        p = jnp.exp(s)
        p = p * pl.reciprocal(jnp.sum(p, axis=-1, keepdims=True), approx=True)
        oh = jnp.dot(p.astype(jnp.bfloat16), vh, preferred_element_type=jnp.float32)
        attn_scr[:, sl] = oh.astype(jnp.bfloat16)      # column-slice store, no concat

    proj = jnp.dot(attn_scr[...], wo_ref[...],
                   preferred_element_type=jnp.float32) + bo_ref[...]
    out_ref[0] = x + proj


def _mlp_kernel(x_ref, ln_g_ref, ln_b_ref, w1_ref, b1_ref, w2_ref, b2_ref,
                out_ref, xn_scr, acc_scr):
    # grid = (B, ff_tiles).  w1/w2 blocks slide along ff_dim so their DMA
    # double-buffers behind the MXU work; acc_scr is the f32 accumulator.
    k = pl.program_id(1)

    @pl.when(k == 0)
    def _():
        xn = _layer_norm_f32(x_ref[0], ln_g_ref[...], ln_b_ref[...])
        xn_scr[...] = xn.astype(jnp.bfloat16)
        acc_scr[...] = jnp.zeros_like(acc_scr)

    h1 = jnp.dot(xn_scr[...], w1_ref[...],
                 preferred_element_type=jnp.float32) + b1_ref[...]     # (S_pad, tf)
    h1 = _gelu_kernel(h1)
    acc_scr[...] += jnp.dot(h1.astype(jnp.bfloat16), w2_ref[...],
                            preferred_element_type=jnp.float32)

    @pl.when(k == pl.num_programs(1) - 1)
    def _():
        out_ref[0] = x_ref[0] + acc_scr[...] + b2_ref[...]


def _head_kernel(x_ref, g_ref, b_ref, wf_ref, bf_ref, out_ref):
    # torch: x = norm(x)[:, 0]; x = fc(x)  (LN is per-token, so slice-then-norm ok)
    x0 = x_ref[0, 0:1, :]                                              # (1, D)
    xn = _layer_norm_f32(x0, g_ref[...], b_ref[...]).astype(jnp.bfloat16)
    out_ref[...] = jnp.dot(xn, wf_ref[...],
                           preferred_element_type=jnp.float32) + bf_ref[...]


# ----------------------------------------------------------------------------
# pallas_call wrappers
# ----------------------------------------------------------------------------
def _full_spec(shape):
    nd = len(shape)
    return pl.BlockSpec(shape, lambda *_: (0,) * nd)


def _arr_bytes(a):
    return a.size * a.dtype.itemsize


def _compiler_params(semantics, block_bytes, scratch_bytes=0):
    # 2x for double-buffering of every pipelined block + slack; clamp so the
    # request stays safe on every generation (>= v5e default, <= v7x physical).
    est = 2 * int(block_bytes) + int(scratch_bytes) + (8 << 20)
    limit = max(32 << 20, min(est, 64 << 20))
    return pltpu.CompilerParams(dimension_semantics=semantics,
                                vmem_limit_bytes=limit)


def patch_embed_call(patches, wp, bp, cls_tok, pos, seq_pad):
    B, Sp, P = patches.shape
    S_real, D = pos.shape
    blk = (Sp * P * 4 + _arr_bytes(wp) + _arr_bytes(bp) + _arr_bytes(cls_tok)
           + _arr_bytes(pos) + seq_pad * D * 4)
    return pl.pallas_call(
        functools.partial(_embed_kernel, seq_valid=S_real),
        out_shape=jax.ShapeDtypeStruct((B, seq_pad, D), jnp.float32),
        grid=(B,),
        in_specs=[pl.BlockSpec((1, Sp, P), lambda b: (b, 0, 0)),
                  _full_spec(wp.shape), _full_spec(bp.shape),
                  _full_spec(cls_tok.shape), _full_spec(pos.shape)],
        out_specs=pl.BlockSpec((1, seq_pad, D), lambda b: (b, 0, 0)),
        compiler_params=_compiler_params(("parallel",), blk),
    )(patches, wp, bp, cls_tok, pos)


def attn_call(x, lp, num_heads, seq_valid):
    B, S_pad, D = x.shape
    weights = [lp["ln1_g"], lp["ln1_b"], lp["wqkv"], lp["bqkv"], lp["wo"], lp["bo"]]
    blk = 2 * S_pad * D * 4 + sum(_arr_bytes(w) for w in weights)
    scratch = S_pad * D * 2
    return pl.pallas_call(
        functools.partial(_attn_kernel, num_heads=num_heads, seq_valid=seq_valid),
        out_shape=jax.ShapeDtypeStruct((B, S_pad, D), jnp.float32),
        grid=(B,),
        in_specs=[pl.BlockSpec((1, S_pad, D), lambda b: (b, 0, 0))]
                 + [_full_spec(w.shape) for w in weights],
        out_specs=pl.BlockSpec((1, S_pad, D), lambda b: (b, 0, 0)),
        scratch_shapes=[pltpu.VMEM((S_pad, D), jnp.bfloat16)],
        compiler_params=_compiler_params(("parallel",), blk, scratch),
    )(x, *weights)


def _pick_ff_tile(ff_dim):
    # Block last dim must be a multiple of 128 or the full extent.
    for t in (512, 256, 128):
        if ff_dim % t == 0:
            return t
    return ff_dim


def mlp_call(x, lp):
    B, S_pad, D = x.shape
    ff_dim = lp["w1"].shape[1]
    tf = _pick_ff_tile(ff_dim)
    nk = ff_dim // tf
    blk = (2 * S_pad * D * 4 + 4 * D * 4        # x in/out, ln2 g/b, b2
           + D * tf * 2 + tf * 4 + tf * D * 2)  # w1/b1/w2 tiles
    scratch = S_pad * D * 2 + S_pad * D * 4
    return pl.pallas_call(
        _mlp_kernel,
        out_shape=jax.ShapeDtypeStruct((B, S_pad, D), jnp.float32),
        grid=(B, nk),
        in_specs=[pl.BlockSpec((1, S_pad, D), lambda b, k: (b, 0, 0)),
                  pl.BlockSpec((1, D), lambda b, k: (0, 0)),
                  pl.BlockSpec((1, D), lambda b, k: (0, 0)),
                  pl.BlockSpec((D, tf), lambda b, k: (0, k)),
                  pl.BlockSpec((1, tf), lambda b, k: (0, k)),
                  pl.BlockSpec((tf, D), lambda b, k: (k, 0)),
                  pl.BlockSpec((1, D), lambda b, k: (0, 0))],
        out_specs=pl.BlockSpec((1, S_pad, D), lambda b, k: (b, 0, 0)),
        scratch_shapes=[pltpu.VMEM((S_pad, D), jnp.bfloat16),
                        pltpu.VMEM((S_pad, D), jnp.float32)],
        compiler_params=_compiler_params(("parallel", "arbitrary"), blk, scratch),
    )(x, lp["ln2_g"], lp["ln2_b"], lp["w1"], lp["b1"], lp["w2"], lp["b2"])


def head_call(x, ln_g, ln_b, wf, bf_):
    B, S_pad, D = x.shape
    NC = wf.shape[1]
    rows = min(8, S_pad)  # only the 8-row window holding the CLS token is DMA'd
    blk = (rows * D * 4 + _arr_bytes(wf) + _arr_bytes(ln_g) + _arr_bytes(ln_b)
           + _arr_bytes(bf_) + NC * 4)
    return pl.pallas_call(
        _head_kernel,
        out_shape=jax.ShapeDtypeStruct((B, NC), jnp.float32),
        grid=(B,),
        in_specs=[pl.BlockSpec((1, rows, D), lambda b: (b, 0, 0)),
                  _full_spec(ln_g.shape), _full_spec(ln_b.shape),
                  _full_spec(wf.shape), _full_spec(bf_.shape)],
        out_specs=pl.BlockSpec((1, NC), lambda b: (b, 0)),
        compiler_params=_compiler_params(("parallel",), blk),
    )(x, ln_g, ln_b, wf, bf_)


# ----------------------------------------------------------------------------
# glue: patch extraction, weight staging, full forward
# ----------------------------------------------------------------------------
def extract_patches(x_img, fh):
    # (B, C, H, W) NCHW -> (B, gh*gw, C*fh*fh), matching
    # Conv2d(stride=patch).flatten(2).transpose(1, 2) patch ordering.
    B, C, H, W = x_img.shape
    gh, gw = H // fh, W // fh
    x = x_img.reshape(B, C, gh, fh, gw, fh)
    x = x.transpose(0, 2, 4, 1, 3, 5)
    return x.reshape(B, gh * gw, C * fh * fh)


def stage_params(params):
    # bf16 weight staging for the MXU + fused QKV; biases / LN params stay f32.
    bf = lambda w: w.astype(jnp.bfloat16)
    staged = {
        "wp": bf(params["wp"]), "bp": params["bp"],
        "cls": params["cls"], "pos": params["pos"],
        "ln_g": params["ln_g"], "ln_b": params["ln_b"],
        "wf": bf(params["wf"]), "bf": params["bf"],
        "layers": [],
    }
    for lp in params["layers"]:
        staged["layers"].append({
            "ln1_g": lp["ln1_g"], "ln1_b": lp["ln1_b"],
            "wqkv": bf(jnp.concatenate([lp["wq"], lp["wk"], lp["wv"]], axis=1)),
            "bqkv": jnp.concatenate([lp["bq"], lp["bk"], lp["bv"]], axis=1),
            "wo": bf(lp["wo"]), "bo": lp["bo"],
            "ln2_g": lp["ln2_g"], "ln2_b": lp["ln2_b"],
            "w1": bf(lp["w1"]), "b1": lp["b1"],
            "w2": bf(lp["w2"]), "b2": lp["b2"],
        })
    return staged


def vit_forward(x_img, params, *, patch, num_heads, seq_align=128):
    patches = extract_patches(x_img, patch)
    staged = stage_params(params)
    S_real = patches.shape[1] + 1                    # +1 class token
    S_pad = _round_up(S_real, seq_align)             # lane-dense (S,S) softmax
    x = patch_embed_call(patches, staged["wp"], staged["bp"], staged["cls"],
                         staged["pos"], S_pad)
    for lp in staged["layers"]:
        x = attn_call(x, lp, num_heads, S_real)
        x = mlp_call(x, lp)
    return head_call(x, staged["ln_g"], staged["ln_b"], staged["wf"], staged["bf"])


# pure-JAX reference (no Pallas).  mat_dtype=bf16 mirrors the kernel's MXU
# input precision (f32 accumulation); mat_dtype=f32 is the torch-semantics ref.
def vit_reference(x_img, params, *, patch, num_heads, mat_dtype=jnp.float32):
    def mm(a, b):
        return jnp.dot(a.astype(mat_dtype), b.astype(mat_dtype),
                       preferred_element_type=jnp.float32)

    patches = extract_patches(x_img, patch)
    x = mm(patches, params["wp"]) + params["bp"]
    B, D = x.shape[0], x.shape[-1]
    cls = jnp.broadcast_to(params["cls"][None], (B, 1, D))
    x = jnp.concatenate([cls, x], axis=1) + params["pos"][None]
    S = x.shape[1]
    hd = D // num_heads
    for lp in params["layers"]:
        xn = _layer_norm_f32(x, lp["ln1_g"], lp["ln1_b"])
        q = mm(xn, lp["wq"]) + lp["bq"]
        k = mm(xn, lp["wk"]) + lp["bk"]
        v = mm(xn, lp["wv"]) + lp["bv"]
        qh = q.reshape(B, S, num_heads, hd).transpose(0, 2, 1, 3)
        kh = k.reshape(B, S, num_heads, hd).transpose(0, 2, 1, 3)
        vh = v.reshape(B, S, num_heads, hd).transpose(0, 2, 1, 3)
        s = jnp.einsum("bhqd,bhkd->bhqk", qh.astype(mat_dtype), kh.astype(mat_dtype),
                       preferred_element_type=jnp.float32) / math.sqrt(hd)
        p = jax.nn.softmax(s, axis=-1)
        o = jnp.einsum("bhqk,bhkd->bhqd", p.astype(mat_dtype), vh.astype(mat_dtype),
                       preferred_element_type=jnp.float32)
        o = o.transpose(0, 2, 1, 3).reshape(B, S, D)
        x = x + (mm(o, lp["wo"]) + lp["bo"])
        xn2 = _layer_norm_f32(x, lp["ln2_g"], lp["ln2_b"])
        h1 = jax.nn.gelu(mm(xn2, lp["w1"]) + lp["b1"], approximate=False)
        x = x + (mm(h1, lp["w2"]) + lp["b2"])
    x0 = _layer_norm_f32(x, params["ln_g"], params["ln_b"])[:, 0]
    return mm(x0, params["wf"]) + params["bf"]


# ----------------------------------------------------------------------------
# deterministic parameter construction (shapes per ViT.__init__)
# ----------------------------------------------------------------------------
def init_params(key, *, in_channels, patch, dim, ff_dim, num_layers, seq_len, num_classes):
    P = in_channels * patch * patch

    def nxt():
        nonlocal key
        key, sub = jax.random.split(key)
        return sub

    def rnd(shape, scale=0.05):
        return jax.random.normal(nxt(), shape, jnp.float32) * scale

    params = {
        "wp": rnd((P, dim)),                 # Conv2d(k=patch, stride=patch) as matmul
        "bp": rnd((1, dim), 0.01),
        "cls": rnd((1, dim), 0.02),          # class_token  (torch shape (1,1,dim))
        "pos": rnd((seq_len, dim), 0.02),    # pos_embedding (torch shape (1,seq,dim))
        "ln_g": jnp.ones((1, dim), jnp.float32),
        "ln_b": jnp.zeros((1, dim), jnp.float32),
        "wf": rnd((dim, num_classes)),       # torch zero-inits fc; random for a nontrivial check
        "bf": rnd((1, num_classes), 0.01),
        "layers": [],
    }
    for _ in range(num_layers):
        params["layers"].append({
            "ln1_g": jnp.ones((1, dim), jnp.float32),
            "ln1_b": jnp.zeros((1, dim), jnp.float32),
            "wq": rnd((dim, dim)), "bq": rnd((1, dim), 0.01),
            "wk": rnd((dim, dim)), "bk": rnd((1, dim), 0.01),
            "wv": rnd((dim, dim)), "bv": rnd((1, dim), 0.01),
            "wo": rnd((dim, dim)), "bo": rnd((1, dim), 0.01),
            "ln2_g": jnp.ones((1, dim), jnp.float32),
            "ln2_b": jnp.zeros((1, dim), jnp.float32),
            "w1": rnd((dim, ff_dim)), "b1": rnd((1, ff_dim), 0.01),
            "w2": rnd((ff_dim, dim)), "b2": rnd((1, dim), 0.01),
        })
    return params


if __name__ == "__main__":
    # small ViT config: image 16x16, patch 8 -> 2x2 = 4 patches (+1 cls token)
    B, C, IMG, PATCH = 2, 3, 16, 8
    DIM, FF_DIM, HEADS, LAYERS, NUM_CLASSES = 32, 64, 4, 2, 16
    SEQ = (IMG // PATCH) * (IMG // PATCH) + 1

    key = jax.random.PRNGKey(0)
    key, xkey, pkey = jax.random.split(key, 3)
    x = jax.random.normal(xkey, (B, C, IMG, IMG), jnp.float32)

    params = init_params(pkey, in_channels=C, patch=PATCH, dim=DIM, ff_dim=FF_DIM,
                         num_layers=LAYERS, seq_len=SEQ, num_classes=NUM_CLASSES)

    out = vit_forward(x, params, patch=PATCH, num_heads=HEADS)
    out = jax.block_until_ready(out)
    assert out.shape == (B, NUM_CLASSES)
    assert bool(jnp.all(jnp.isfinite(out)))

    # Tight check vs a pure-JAX reference that mirrors the kernel's bf16 MXU
    # inputs (f32 accumulation) but uses exact softmax/gelu divides.
    ref_bf16 = vit_reference(x, params, patch=PATCH, num_heads=HEADS,
                             mat_dtype=jnp.bfloat16)
    err_bf16 = float(jnp.max(jnp.abs(out - ref_bf16)))
    assert jnp.allclose(out, ref_bf16, atol=1e-2, rtol=1e-2), \
        f"bf16-mirrored ref max abs diff {err_bf16}"

    # Looser sanity check vs the full-f32 (PyTorch-semantics) reference.
    ref_f32 = vit_reference(x, params, patch=PATCH, num_heads=HEADS,
                            mat_dtype=jnp.float32)
    err_f32 = float(jnp.max(jnp.abs(out - ref_f32)))
    assert jnp.allclose(out, ref_f32, atol=1e-1, rtol=1e-1), \
        f"f32 ref max abs diff {err_f32}"

    # TODO(synk): dropout layers are identity (inference mode); pretrained
    # checkpoint loading and pre_logits (representation_size) path omitted per
    # default constructor args.
    print("KERNEL_OK")
</pallas_src>

<mosaic_0001>
module attributes {stable_mosaic.version = 11 : i64} {
  func.func @_embed_kernel(%arg0: i32, %arg1: memref<1x4x192xf32, #tpu.memory_space<vmem>>, %arg2: memref<192x32xbf16, #tpu.memory_space<vmem>>, %arg3: memref<1x32xf32, #tpu.memory_space<vmem>>, %arg4: memref<1x32xf32, #tpu.memory_space<vmem>>, %arg5: memref<5x32xf32, #tpu.memory_space<vmem>>, %arg6: memref<1x128x32xf32, #tpu.memory_space<vmem>>) attributes {dimension_semantics = [#tpu.dimension_semantics<parallel>], iteration_bounds = array<i64: 2>, scalar_prefetch = 0 : i64, scratch_operands = 0 : i64, tpu.core_type = #tpu.core_type<tc>, window_params = [{transform_indices = @transform_0, window_bounds = array<i64: 1, 4, 192>}, {pipeline_mode = #tpu.pipeline_mode<synchronous>, transform_indices = @transform_1, window_bounds = array<i64: 192, 32>}, {pipeline_mode = #tpu.pipeline_mode<synchronous>, transform_indices = @transform_2, window_bounds = array<i64: 1, 32>}, {pipeline_mode = #tpu.pipeline_mode<synchronous>, transform_indices = @transform_3, window_bounds = array<i64: 1, 32>}, {pipeline_mode = #tpu.pipeline_mode<synchronous>, transform_indices = @transform_4, window_bounds = array<i64: 5, 32>}, {transform_indices = @transform_5, window_bounds = array<i64: 1, 128, 32>}]} {
    %c0 = arith.constant 0 : index
    %c0_0 = arith.constant 0 : index
    %c0_1 = arith.constant 0 : index
    %0 = vector.load %arg1[%c0, %c0_0, %c0_1] : memref<1x4x192xf32, #tpu.memory_space<vmem>>, vector<1x4x192xf32>
    %1 = vector.shape_cast %0 : vector<1x4x192xf32> to vector<4x192xf32>
    %2 = arith.truncf %1 : vector<4x192xf32> to vector<4x192xbf16>
    %c0_2 = arith.constant 0 : index
    %c0_3 = arith.constant 0 : index
    %3 = vector.load %arg2[%c0_2, %c0_3] : memref<192x32xbf16, #tpu.memory_space<vmem>>, vector<192x32xbf16>
    %cst = arith.constant dense<0.000000e+00> : vector<4x32xf32>
    %4 = tpu.matmul %2, %3, %cst {dimension_numbers = #tpu.dot_dimension_numbers<[1], [0], [0], [1], [0, 0, 1, 1], [], []>} : vector<4x192xbf16>, vector<192x32xbf16>, vector<4x32xf32> -> vector<4x32xf32>
    %c0_4 = arith.constant 0 : index
    %c0_5 = arith.constant 0 : index
    %5 = vector.load %arg3[%c0_4, %c0_5] : memref<1x32xf32, #tpu.memory_space<vmem>>, vector<1x32xf32>
    %6 = vector.broadcast %5 : vector<1x32xf32> to vector<4x32xf32>
    %7 = arith.addf %4, %6 : vector<4x32xf32>
    %cst_6 = arith.constant 0.000000e+00 : f32
    %8 = vector.broadcast %cst_6 : f32 to vector<128x32xf32>
    %c0_7 = arith.constant 0 : index
    %c0_8 = arith.constant 0 : index
    %c0_9 = arith.constant 0 : index
    %9 = vector.load %arg6[%c0_7, %c0_8, %c0_9] : memref<1x128x32xf32, #tpu.memory_space<vmem>>, vector<1x128x32xf32>
    %10 = vector.shape_cast %9 : vector<1x128x32xf32> to vector<128x32xf32>
    %11 = vector.shape_cast %8 : vector<128x32xf32> to vector<1x128x32xf32>
    tpu.vector_store %arg6[%c0_7, %c0_8, %c0_9], %11 {strides = array<i32>} : memref<1x128x32xf32, #tpu.memory_space<vmem>>, vector<1x128x32xf32>,
    %c0_10 = arith.constant 0 : index
    %c0_11 = arith.constant 0 : index
    %12 = vector.load %arg4[%c0_10, %c0_11] : memref<1x32xf32, #tpu.memory_space<vmem>>, vector<1x32xf32>
    %c0_12 = arith.constant 0 : index
    %c0_13 = arith.constant 0 : index
    %13 = vector.load %arg5[%c0_12, %c0_13] : memref<5x32xf32, #tpu.memory_space<vmem>>, vector<1x32xf32>
    %14 = arith.addf %12, %13 : vector<1x32xf32>
    %c0_14 = arith.constant 0 : index
    %c0_15 = arith.constant 0 : index
    %c0_16 = arith.constant 0 : index
    %15 = vector.load %arg6[%c0_14, %c0_15, %c0_16] : memref<1x128x32xf32, #tpu.memory_space<vmem>>, vector<1x1x32xf32>
    %16 = vector.shape_cast %15 : vector<1x1x32xf32> to vector<1x32xf32>
    %17 = vector.shape_cast %14 : vector<1x32xf32> to vector<1x1x32xf32>
    tpu.vector_store %arg6[%c0_14, %c0_15, %c0_16], %17 {strides = array<i32>} : memref<1x128x32xf32, #tpu.memory_space<vmem>>, vector<1x1x32xf32>,
    %c1 = arith.constant 1 : index
    %c0_17 = arith.constant 0 : index
    %18 = vector.load %arg5[%c1, %c0_17] : memref<5x32xf32, #tpu.memory_space<vmem>>, vector<4x32xf32>
    %19 = arith.addf %7, %18 : vector<4x32xf32>
    %c0_18 = arith.constant 0 : index
    %c1_19 = arith.constant 1 : index
    %c0_20 = arith.constant 0 : index
    %20 = vector.load %arg6[%c0_18, %c1_19, %c0_20] : memref<1x128x32xf32, #tpu.memory_space<vmem>>, vector<1x4x32xf32>
    %21 = vector.shape_cast %20 : vector<1x4x32xf32> to vector<4x32xf32>
    %22 = vector.shape_cast %19 : vector<4x32xf32> to vector<1x4x32xf32>
    tpu.vector_store %arg6[%c0_18, %c1_19, %c0_20], %22 {strides = array<i32>} : memref<1x128x32xf32, #tpu.memory_space<vmem>>, vector<1x4x32xf32>,
    return
  }
  func.func @transform_0(%arg0: i32) -> (i32, i32, i32) {
    %c0_i32 = arith.constant 0 : i32
    %c0_i32_0 = arith.constant 0 : i32
    %c0_i32_1 = arith.constant 0 : i32
    return %arg0, %c0_i32, %c0_i32_0 : i32, i32, i32
  }
  func.func @transform_1(%arg0: i32) -> (i32, i32) {
    %c0_i32 = arith.constant 0 : i32
    %c0_i32_0 = arith.constant 0 : i32
    %c0_i32_1 = arith.constant 0 : i32
    return %c0_i32, %c0_i32_0 : i32, i32
  }
  func.func @transform_2(%arg0: i32) -> (i32, i32) {
    %c0_i32 = arith.constant 0 : i32
    %c0_i32_0 = arith.constant 0 : i32
    %c0_i32_1 = arith.constant 0 : i32
    return %c0_i32, %c0_i32_0 : i32, i32
  }
  func.func @transform_3(%arg0: i32) -> (i32, i32) {
    %c0_i32 = arith.constant 0 : i32
    %c0_i32_0 = arith.constant 0 : i32
    %c0_i32_1 = arith.constant 0 : i32
    return %c0_i32, %c0_i32_0 : i32, i32
  }
  func.func @transform_4(%arg0: i32) -> (i32, i32) {
    %c0_i32 = arith.constant 0 : i32
    %c0_i32_0 = arith.constant 0 : i32
    %c0_i32_1 = arith.constant 0 : i32
    return %c0_i32, %c0_i32_0 : i32, i32
  }
  func.func @transform_5(%arg0: i32) -> (i32, i32, i32) {
    %c0_i32 = arith.constant 0 : i32
    %c0_i32_0 = arith.constant 0 : i32
    %c0_i32_1 = arith.constant 0 : i32
    return %arg0, %c0_i32, %c0_i32_0 : i32, i32, i32
  }
}

</mosaic_0001>

<bundles_post_ra>
// kernel: tpu_custom_call.1
= control target key start
LH: loop header
LB: loop body
LE: loop exit
PB: predicated region body
PF: predicated region fallthrough
CT: control target
= control target key end

     0   :  { %s550_s18 = smov 0   ;;  %s655_s0 = inlined_call_operand.vmem [shape: f32[2,4,192], index: 0, kind: input, shape index: {}]   ;;  %s656_s1 = inlined_call_operand.vmem [shape: bf16[192,32], index: 1, kind: input, shape index: {}]   ;;  %s657_s2 = inlined_call_operand.vmem [shape: f32[1,32], index: 2, kind: input, shape index: {}]   ;;  %s658_s3 = inlined_call_operand.vmem [shape: f32[1,32], index: 3, kind: input, shape index: {}]   ;;  %s659_s4 = inlined_call_operand.vmem [shape: f32[5,32], index: 4, kind: input, shape index: {}]   ;;  %s660_s5 = inlined_call_operand.vmem [shape: f32[2,128,32], index: 5, kind: output, shape index: {}]  }
   0x1 LB: > { %s460_s19 = sadd.s32 4294967295, %s516_s18   ;;  %p464_p0 = scmp.ge.s32.totalorder %s516_s18, 1  ;;  %s516_s18 = sphi %s550_s18, %s15_s18  }
   0x2   : > { %p187_p1 = scmp.lt.s32.totalorder %s516_s18, 3 }
   0x4   : > { %p188_p2 = pnand %p464_p0, %p187_p1 }
   0x5   : > { %v497_v0 = vld [vmem:[%s656_s1] sm:$0xff] (!%p188_p2)   ;;  %v518_v1 = vmov (!%p188_p2), 0   ;;  %p215_p3 = scmp.lt.s32.totalorder (!%p188_p2), %s460_s19, 1  ;;  %v498_v2 = vld [vmem:[%s656_s1 + $0x8] sm:$0xff] (!%p188_p2)   ;;  %v499_v3 = vld [vmem:[%s656_s1 + $0x10] sm:$0xff] (!%p188_p2)   ;;  %vm335_vm0 = vcmask (!%p188_p2), 523264  }
   0x6   : > { %191 = sbr.rel (%p188_p2) target bundleno = 271 (0x10f), region = 40  ;;  %339 = vmatprep.subr.bf16.mxu0 (!%p188_p2), %v518_v1  ;;  %v500_v4 = vld [vmem:[%s656_s1 + $0x18] sm:$0xff] (!%p188_p2)   ;;  %v501_v7 = vld [vmem:[%s656_s1 + $0x20] sm:$0xff] (!%p188_p2)   ;;  %v502_v9 = vld [vmem:[%s656_s1 + $0x28] sm:$0xff] (!%p188_p2)   ;;  %vm379_vm1 = vcmask (!%p188_p2), 261120   ;;  %v519_v19 = vmov (!%p188_p2), 0.0  }
   0x7   : > { %340 = vmatpush1.bf16.msra.mxu0 (!%p188_p2), %v497_v0  ;;  %v503_v10 = vld [vmem:[%s656_s1 + $0x30] sm:$0xff] (!%p188_p2)   ;;  %v504_v11 = vld [vmem:[%s656_s1 + $0x38] sm:$0xff] (!%p188_p2)   ;;  %v505_v12 = vld [vmem:[%s656_s1 + $0x40] sm:$0xff] (!%p188_p2)   ;;  %vm399_vm2 = vcmask (!%p188_p2), 253952   ;;  %vm403_vm3 = vcmask (!%p188_p2), 257024  }
   0x8   : > { %341 = vmatprep.subr.bf16.mxu0 (!%p188_p2), %v518_v1  ;;  %v506_v13 = vld [vmem:[%s656_s1 + $0x48] sm:$0xff] (!%p188_p2)   ;;  %v507_v14 = vld [vmem:[%s656_s1 + $0x50] sm:$0xff] (!%p188_p2)   ;;  %v508_v15 = vld [vmem:[%s656_s1 + $0x58] sm:$0xff] (!%p188_p2)  }
   0x9   : > { %v396_v17 = vld [vmem:[%s658_s3] sm:$0x1] (!%p188_p2)  ;;  %v401_v23 = vld [vmem:[%s659_s4 + $0x1] sm:$0xf] (!%p188_p2) }
   0xa   : > { %v397_v18 = vld [vmem:[%s659_s4] sm:$0x1] (!%p188_p2) }
   0xb   : > { %342 = vmatpush1.bf16.msra.mxu0 (!%p188_p2), %v498_v2  ;;  %v398_v20 = vadd.f32 (!%p188_p2), %v397_v18, %v396_v17  ;;  %v469_v21 = vld [vmem:[%s657_s2] ss:$0 sm:$0xff] (!%p188_p2) }
   0xc   : > { %343 = vmatprep.subr.bf16.mxu0 (!%p188_p2), %v518_v1 }
   0xd   : > { %s662_s19 = smov (!%p215_p3, %s460_s19), 1 }
   0xe   : > { %s485_s26 = sshll.u32 %s662_s19, 3  ;;  %s486_s25 = sshll.u32 %s662_s19, 7 }
   0xf   : > { %s219_s29 = scalar_lea.vmem %s655_s0, %s485_s26  ;;  %344 = vmatpush1.bf16.msra.mxu0 %v499_v3  ;;  %s604_s28 = scalar_lea.vmem %s660_s5, %s486_s25 }
  0x10   : > { %345 = vmatprep.subr.bf16.mxu0 %v518_v1  ;;  %v226_v5 = vld [vmem:[%s219_s29] sm:$0xff]  ;;  %380 = vst.msk [vmem:[%s604_s28] sm:$0xff] %vm379_vm1, %v519_v19  ;;  %381 = vst.msk [vmem:[%s604_s28 + $0x8] sm:$0xff] %vm379_vm1, %v519_v19 }
  0x11   : > { %v228_v6 = vcombine.high %v226_v5, %v226_v5  ;;  %v230_v16 = vpack.c.bf16 %v226_v5, %v226_v5  ;;  %382 = vst.msk [vmem:[%s604_s28 + $0x10] sm:$0xff] %vm379_vm1, %v519_v19  ;;  %383 = vst.msk [vmem:[%s604_s28 + $0x18] sm:$0xff] %vm379_vm1, %v519_v19 }
  0x12   : > { %384 = vst.msk [vmem:[%s604_s28 + $0x20] sm:$0xff] %vm379_vm1, %v519_v19  ;;  %385 = vst.msk [vmem:[%s604_s28 + $0x28] sm:$0xff] %vm379_vm1, %v519_v19 }
  0x13   : > { %346 = vmatpush1.bf16.msra.mxu0 %v500_v4  ;;  %v231_v8 = vpack.c.bf16 %v228_v6, %v228_v6  ;;  %386 = vst.msk [vmem:[%s604_s28 + $0x30] sm:$0xff] %vm379_vm1, %v519_v19  ;;  %387 = vst.msk [vmem:[%s604_s28 + $0x38] sm:$0xff] %vm379_vm1, %v519_v19 }
  0x14   : > { %347 = vmatprep.subr.bf16.mxu0 %v518_v1  ;;  %388 = vst.msk [vmem:[%s604_s28 + $0x40] sm:$0xff] %vm379_vm1, %v519_v19  ;;  %389 = vst.msk [vmem:[%s604_s28 + $0x48] sm:$0xff] %vm379_vm1, %v519_v19 }
  0x15   : > { %482 = vmatprep.mubr.msk.bf16.mxu0 %vm335_vm0, %v231_v8  ;;  %390 = vst.msk [vmem:[%s604_s28 + $0x50] sm:$0xff] %vm379_vm1, %v519_v19  ;;  %391 = vst.msk [vmem:[%s604_s28 + $0x58] sm:$0xff] %vm379_vm1, %v519_v19 }
  0x16   : > { %392 = vst.msk [vmem:[%s604_s28 + $0x60] sm:$0xff] %vm379_vm1, %v519_v19  ;;  %393 = vst.msk [vmem:[%s604_s28 + $0x68] sm:$0xff] %vm379_vm1, %v519_v19 }
  0x17   : > { %348 = vmatpush1.bf16.msra.mxu0 %v501_v7  ;;  %394 = vst.msk [vmem:[%s604_s28 + $0x70] sm:$0xff] %vm379_vm1, %v519_v19  ;;  %395 = vst.msk [vmem:[%s604_s28 + $0x78] sm:$0xff] %vm379_vm1, %v519_v19 }
  0x18   : > { %349 = vmatprep.subr.bf16.mxu0 %v518_v1  ;;  %400 = vst.msk [vmem:[%s604_s28] sm:$0x1] %vm399_vm2, %v398_v20 }
  0x1b   : > { %350 = vmatpush1.bf16.msra.mxu0 %v502_v9 }
  0x1c   : > { %351 = vmatprep.subr.bf16.mxu0 %v518_v1 }
  0x1f   : > { %352 = vmatpush1.bf16.msra.mxu0 %v503_v10 }
  0x20   : > { %353 = vmatprep.subr.bf16.mxu0 %v518_v1 }
  0x23   : > { %354 = vmatpush1.bf16.msra.mxu0 %v504_v11 }
  0x24   : > { %355 = vmatprep.subr.bf16.mxu0 %v518_v1 }
  0x27   : > { %356 = vmatpush1.bf16.msra.mxu0 %v505_v12 }
  0x28   : > { %357 = vmatprep.subr.bf16.mxu0 %v518_v1 }
  0x2b   : > { %358 = vmatpush1.bf16.msra.mxu0 %v506_v13 }
  0x2c   : > { %359 = vmatprep.subr.bf16.mxu0 %v518_v1 }
  0x2f   : > { %360 = vmatpush1.bf16.msra.mxu0 %v507_v14 }
  0x30   : > { %361 = vmatprep.subr.bf16.mxu0 %v518_v1 }
  0x33   : > { %362 = vmatpush1.bf16.msra.mxu0 %v508_v15 }
  0x36   : > { %372 = vmatmul.mubr.bf16.vlgmr.msra.gmra.mrb[0].mxu0 %v230_v16 }
 0x109   : > { %v373_v22 = vpop.f32.mrb[0].mxu0 }
 0x10a   : > { %v374_v24 = vadd.f32 %v469_v21, %v373_v22  ;;  %v375_v25 = vpop.f32.mrb[1].mxu0 }
 0x10b   : > { %v376_v26 = vpop.f32.mrb[2].mxu0 }
 0x10c   : > { %v402_v27 = vadd.f32 %v401_v23, %v374_v24  ;;  %v377_v28 = vpop.f32.mrb[3].mxu0 }
 0x10e   : > { %404 = vst.msk [vmem:[%s604_s28 + $0x1] sm:$0xf] %vm403_vm3, %v402_v27 }
 0x10f PF: > { %s15_s18 = sadd.s32 1, %s516_s18  }
 0x110   : > { %p12_p4 = scmp.ge.s32.totalorder %s15_s18, 4  }
 0x112   :  { %14 = sbr.rel (!%p12_p4) target bundleno = 1 (0x1), region = 70 }

</bundles_post_ra>
